<compile_context>
chip_gen: v7x
topology: tpu7x:2x2x1
jax: 0.10.0
libtpu: 0.0.40
codegen_flags: <defaults>
</compile_context>

<pallas_src>
import math
import functools

import jax
import jax.numpy as jnp
from jax.experimental import pallas as pl
from jax.experimental.pallas import tpu as pltpu

D_MODEL = 32
MAX_LEN = 1000
DROPOUT_P = 0.1


def make_pe(d_model: int = D_MODEL, max_len: int = MAX_LEN) -> jnp.ndarray:
    """Deterministic sinusoidal table, matching the torch __init__ exactly."""
    flag = (d_model % 2 == 0)
    d_new = d_model if flag else d_model + 1
    position = jnp.arange(max_len, dtype=jnp.float32)[:, None]              # [L, 1]
    div_term = jnp.exp(
        jnp.arange(0, d_new, 2, dtype=jnp.float32) * (-math.log(10000.0) / d_model)
    )                                                                       # [d_new//2]
    pe = jnp.zeros((max_len, d_new), jnp.float32)
    pe = pe.at[:, 0::2].set(jnp.sin(position * div_term))
    pe = pe.at[:, 1::2].set(jnp.cos(position * div_term))
    if not flag:
        # Torch quirk for odd d_model collapses pe to 1-D; incompatible with
        # the [S, D] slicing this wrapper relies on.
        raise NotImplementedError("odd d_model not supported by this kernel")
    return pe                                                               # [max_len, d_model]


# ----------------------------------------------------------------------------
# Kernels (operate on the lane-dense flattened slab [rows, S*D]).
# ----------------------------------------------------------------------------

def _posenc_eval_kernel(x_ref, pe_ref, o_ref):
    # x_ref: (TB, SD), pe_ref: (1, SD) -> sublane broadcast add.
    o_ref[...] = x_ref[...] + pe_ref[...]


def _posenc_train_kernel(x_ref, pe_ref, bits_ref, o_ref, *, p: float):
    y = x_ref[...] + pe_ref[...]
    # Integer-domain inverted dropout: keep with prob (1 - p).
    thresh = jnp.uint32(min(int(p * 4294967296.0), 4294967295))
    keep = bits_ref[...] >= thresh
    scale = jnp.float32(1.0 / (1.0 - p))
    o_ref[...] = jnp.where(keep, y * scale, jnp.float32(0.0)).astype(o_ref.dtype)


# ----------------------------------------------------------------------------
# Wrapper
# ----------------------------------------------------------------------------

def _row_tile(batch_rows: int, row_bytes: int, target_bytes: int = 2 << 20) -> int:
    """Largest row tile (multiple of 8 when tiling) under ~target_bytes."""
    rows = max(1, target_bytes // max(1, row_bytes))
    if batch_rows <= rows:
        return batch_rows                       # single/full block (no padding rules)
    return max(8, (rows // 8) * 8)              # keep sublane-aligned tiles


def positional_encoding(x: jnp.ndarray,
                        pe_full: jnp.ndarray,
                        *,
                        p: float = DROPOUT_P,
                        training: bool = False,
                        seed: int = 0) -> jnp.ndarray:
    """x: [B, S, D] float32.  Returns dropout(x + pe[:S, :])."""
    B, S, D = x.shape
    SD = S * D

    # Lane-dense flattening (pure layout plumbing, done in the wrapper).
    x2 = x.reshape(B, SD)
    pe2 = pe_full[:S, :].reshape(1, SD)

    TB = _row_tile(B, SD * 4)
    grid = (pl.cdiv(B, TB),)

    x_spec = pl.BlockSpec((TB, SD), lambda b: (b, 0))
    pe_spec = pl.BlockSpec((1, SD), lambda b: (0, 0))      # VMEM-resident across steps
    out_spec = pl.BlockSpec((TB, SD), lambda b: (b, 0))

    use_dropout = training and p > 0.0

    bytes_accessed = (2 * B * SD + SD) * 4 + (B * SD * 4 if use_dropout else 0)
    cost = pl.CostEstimate(flops=B * SD, transcendentals=0,
                           bytes_accessed=bytes_accessed)
    cparams = pltpu.CompilerParams(dimension_semantics=("parallel",))

    if use_dropout:
        bits = jax.random.bits(jax.random.PRNGKey(seed), (B, SD), dtype=jnp.uint32)
        kernel = functools.partial(_posenc_train_kernel, p=p)
        out2 = pl.pallas_call(
            kernel,
            out_shape=jax.ShapeDtypeStruct((B, SD), x.dtype),
            grid=grid,
            in_specs=[x_spec, pe_spec,
                      pl.BlockSpec((TB, SD), lambda b: (b, 0))],
            out_specs=out_spec,
            compiler_params=cparams,
            cost_estimate=cost,
        )(x2, pe2, bits)
    else:
        out2 = pl.pallas_call(
            _posenc_eval_kernel,
            out_shape=jax.ShapeDtypeStruct((B, SD), x.dtype),
            grid=grid,
            in_specs=[x_spec, pe_spec],
            out_specs=out_spec,
            compiler_params=cparams,
            cost_estimate=cost,
        )(x2, pe2)

    return out2.reshape(B, S, D)


if __name__ == "__main__":
    B, S, D = 2, 8, D_MODEL

    key = jax.random.PRNGKey(0)
    x = jax.random.normal(key, (B, S, D), dtype=jnp.float32)

    pe_full = make_pe(D_MODEL, MAX_LEN)

    # Eval-mode forward (dropout is identity, matching nn.Dropout in eval()).
    out = jax.block_until_ready(positional_encoding(x, pe_full, training=False))
    ref = x + pe_full[None, :S, :]
    assert out.shape == (B, S, D)
    assert jnp.allclose(out, ref, atol=1e-6, rtol=1e-6)

    # Training-mode path: every element is either 0 or (x+pe)/(1-p).
    out_train = jax.block_until_ready(
        positional_encoding(x, pe_full, training=True, seed=123)
    )
    assert out_train.shape == (B, S, D)
    scaled_ref = ref / (1.0 - DROPOUT_P)
    ok = jnp.isclose(out_train, 0.0, atol=1e-6) | jnp.isclose(
        out_train, scaled_ref, atol=1e-5, rtol=1e-5)
    assert bool(jnp.all(ok))

    print("KERNEL_OK")
</pallas_src>

<mosaic_0001>
module attributes {stable_mosaic.version = 11 : i64} {
  func.func @_posenc_eval_kernel(%arg0: i32, %arg1: memref<2x256xf32, #tpu.memory_space<vmem>>, %arg2: memref<1x256xf32, #tpu.memory_space<vmem>>, %arg3: memref<2x256xf32, #tpu.memory_space<vmem>>) attributes {dimension_semantics = [#tpu.dimension_semantics<parallel>], iteration_bounds = array<i64: 1>, scalar_prefetch = 0 : i64, scratch_operands = 0 : i64, tpu.core_type = #tpu.core_type<tc>, window_params = [{transform_indices = @transform_0, window_bounds = array<i64: 2, 256>}, {pipeline_mode = #tpu.pipeline_mode<synchronous>, transform_indices = @transform_1, window_bounds = array<i64: 1, 256>}, {transform_indices = @transform_2, window_bounds = array<i64: 2, 256>}]} {
    %c0 = arith.constant 0 : index
    %c0_0 = arith.constant 0 : index
    %0 = vector.load %arg1[%c0, %c0_0] : memref<2x256xf32, #tpu.memory_space<vmem>>, vector<2x256xf32>
    %c0_1 = arith.constant 0 : index
    %c0_2 = arith.constant 0 : index
    %1 = vector.load %arg2[%c0_1, %c0_2] : memref<1x256xf32, #tpu.memory_space<vmem>>, vector<1x256xf32>
    %2 = vector.broadcast %1 : vector<1x256xf32> to vector<2x256xf32>
    %3 = arith.addf %0, %2 : vector<2x256xf32>
    %c0_3 = arith.constant 0 : index
    %c0_4 = arith.constant 0 : index
    %4 = vector.load %arg3[%c0_3, %c0_4] : memref<2x256xf32, #tpu.memory_space<vmem>>, vector<2x256xf32>
    tpu.vector_store %arg3[%c0_3, %c0_4], %3 {strides = array<i32>} : memref<2x256xf32, #tpu.memory_space<vmem>>, vector<2x256xf32>,
    return
  }
  func.func @transform_0(%arg0: i32) -> (i32, i32) {
    %c0_i32 = arith.constant 0 : i32
    %c0_i32_0 = arith.constant 0 : i32
    return %arg0, %c0_i32 : i32, i32
  }
  func.func @transform_1(%arg0: i32) -> (i32, i32) {
    %c0_i32 = arith.constant 0 : i32
    %c0_i32_0 = arith.constant 0 : i32
    %c0_i32_1 = arith.constant 0 : i32
    return %c0_i32, %c0_i32_0 : i32, i32
  }
  func.func @transform_2(%arg0: i32) -> (i32, i32) {
    %c0_i32 = arith.constant 0 : i32
    %c0_i32_0 = arith.constant 0 : i32
    return %arg0, %c0_i32 : i32, i32
  }
}

</mosaic_0001>

<bundles_post_ra>
// kernel: tpu_custom_call.1
= control target key start
LH: loop header
LB: loop body
LE: loop exit
PB: predicated region body
PF: predicated region fallthrough
CT: control target
= control target key end

     0   :  { %7 = vsyncpa [#allocation3], 0  ;;  %s157_s0 = inlined_call_operand.hbm [shape: f32[2,256], index: 0, kind: input, shape index: {}]   ;;  %s158_s1 = inlined_call_operand.vmem [shape: f32[1,256], index: 1, kind: input, shape index: {}]   ;;  %s159_s2 = inlined_call_operand.hbm [shape: f32[2,256], index: 2, kind: output, shape index: {}]  }
   0x1   :  { %8 = vsyncpa [#allocation4], 0  ;;  %s112_s9 = smov [#allocation2]   ;;  %s64_s13 = scalar_lea.hbm %s157_s0, 64 }
   0x2   :  { %s15_s10 = sshll.u32 %s112_s9, 4  ;;  %p65_p0 = scmp.ne.s32.totalorder %s157_s0, %s64_s13  ;;  %s16_s10 = int_to_ptr.vmem [resolvable:$true] %s15_s10 }
   0x3   :  { %p68_p1 = scmp.lt.u32.totalorder %s64_s13, %s157_s0 }
   0x5   :  { %p70_p2 = pnand %p68_p1, %p65_p0 }
   0x7   :  { %73 = shalt.err (!%p70_p2)
}
   0x8   :  { %s74_s18 = scalar_lea.vmem %s16_s10, 64  ;;  %p79_p4 = scmp.lt.s32.totalorder %s16_s10, %s16_s10 }
   0x9   :  { %p75_p3 = scmp.ne.s32.totalorder %s16_s10, %s74_s18  ;;  %p80_p5 = scmp.lt.s32.totalorder %s74_s18, %s74_s18 }
   0xb   :  { %p81_p6 = por %p80_p5, %p79_p4 }
   0xd   :  { %p82_p7 = pnand %p81_p6, %p75_p3 }
   0xf   :  { %85 = shalt.err (!%p82_p7)
}
  0x10   :  { %18 = dma.hbm_to_vmem [thread:$0]  %s157_s0, 64, %s16_s10, [#allocation3]  }
  0x11   :  { %108 = dma.done.wait [#allocation3], 64  }
  0x12   :  { %109 = vsyncadd [#allocation3], 4294967232  ;;  %v27_v0 = vlaneseq  ;;  %v113_v1 = vmov 1983009808   ;;  %v25_v7 = vld [vmem:[%s158_s1] sm:$0x3] }
  0x13   :  { %v37_v2 = vunpack.c.l.s4 %v113_v1  ;;  %v24_v12 = vld [vmem:[#allocation2] sm:$0xf]  ;;  %s114_s23 = smov [#allocation5]  }
  0x14   :  { %v28_v3 = vshrl.u32 %v27_v0, 7  ;;  %s52_s0 = sshll.u32 %s114_s23, 4  ;;  %s53_s0 = int_to_ptr.vmem [resolvable:$true] %s52_s0 }
  0x15   :  { %v38_v6 = vunpack.c.0.s8 %v37_v2  ;;  %s86_s24 = scalar_lea.vmem %s53_s0, 64  ;;  %p91_p9 = scmp.lt.s32.totalorder %s53_s0, %s53_s0 }
  0x16   :  { %v29_v4 = vsub.s32 0, %v28_v3  ;;  %v33_v5 = vsub.s32 1, %v28_v3  ;;  %p87_p8 = scmp.ne.s32.totalorder %s53_s0, %s86_s24  ;;  %p92_p10 = scmp.lt.s32.totalorder %s86_s24, %s86_s24 }
  0x17   :  { %v41_v10 = vsub.s32 %v38_v6, %v28_v3 }
  0x18   :  { %v30_v8 = vrot.slane %v25_v7, %v29_v4  ;;  %v34_v9 = vrot.slane %v25_v7, %v33_v5  ;;  %p93_p11 = por %p92_p10, %p91_p9 }
  0x1a   :  { %v35_v11 = vcombine.low %v30_v8, %v34_v9  ;;  %p94_p12 = pnand %p93_p11, %p87_p8 }
  0x1c   :  { %v42_v13 = vrot.slane %v35_v11, %v41_v10 }
  0x1e   :  { %v44_v14 = vadd.f32 %v42_v13, %v24_v12 }
  0x20   :  { %45 = vst [vmem:[#allocation5] sm:$0xf] %v44_v14 }
  0x21   :  { %97 = shalt.err (!%p94_p12)
}
  0x22   :  { %s98_s26 = scalar_lea.hbm %s159_s2, 64 }
  0x23   :  { %p99_p13 = scmp.ne.s32.totalorder %s159_s2, %s98_s26  ;;  %p102_p0 = scmp.lt.u32.totalorder %s98_s26, %s159_s2 }
  0x25   :  { %p104_p1 = pnand %p102_p0, %p99_p13 }
  0x27   :  { %107 = shalt.err (!%p104_p1)
}
  0x28   :  { %55 = dma.vmem_to_hbm [thread:$0]  %s53_s0, 64, %s159_s2, [#allocation4]  }
  0x29   :  { %110 = dma.done.wait [#allocation4], 64  }
  0x2a   :  { %111 = vsyncadd [#allocation4], 4294967232 }
  0x2b   :  { %59 = vsyncpa [#allocation3], 1 }
  0x2c   :  { %60 = vsyncpa [#allocation4], 1 }

</bundles_post_ra>
